<compile_context>
chip_gen: v6e
topology: v6e:2x2x1
jax: 0.10.0
libtpu: 0.0.40
codegen_flags: <defaults>
</compile_context>

<pallas_src>
import jax
import jax.numpy as jnp
from jax.experimental import pallas as pl
from jax.experimental.pallas import tpu as pltpu


def fusion_kernel(x_ref, y_ref, z_ref, w1_ref, b1_ref, w2_ref, o_ref):
    x = x_ref[...]            # (TB, C)
    y = y_ref[...]            # (TB, C)
    z = z_ref[...]            # (TB, C)
    w1 = w1_ref[...]          # (C, 128)
    b1 = b1_ref[...]          # (1, 128)
    w2 = w2_ref[...]          # (1, 128)   Linear(128,1) weight as a lane-dense row

    tb = x.shape[0]

    # --- fused attention MLP for all three modalities: one MXU push ---
    feat = jnp.concatenate([x, y, z], axis=0)                                  # (3*TB, C)
    h = jnp.tanh(jnp.dot(feat, w1, preferred_element_type=jnp.float32) + b1)   # (3*TB, 128)

    # 128 -> 1 projection as VPU multiply + lane reduce (avoids a lane-width-1
    # MXU output and a lane-width-1 w2 layout).  b2 is dropped: it is added to
    # all three scores equally and softmax is shift-invariant.
    s = jnp.sum(h * w2, axis=-1, keepdims=True)                                # (3*TB, 1)

    sx = s[0 * tb:1 * tb]
    sy = s[1 * tb:2 * tb]
    sz = s[2 * tb:3 * tb]

    # --- softmax over the 3 modalities ---
    m = jnp.maximum(jnp.maximum(sx, sy), sz)
    ex = jnp.exp(sx - m)
    ey = jnp.exp(sy - m)
    ez = jnp.exp(sz - m)
    inv = pl.reciprocal(ex + ey + ez, approx=True)                             # EUP slot

    # M = A @ featurecom  ==  a_x * x + a_y * y + a_z * z
    o_ref[...] = (ex * inv) * x + (ey * inv) * y + (ez * inv) * z


def _choose_block_b(B, C, budget_bytes=32 * 1024 * 1024):
    """Pick a batch tile that keeps double-buffered streams + temporaries under
    a v7x-safe VMEM budget."""
    # per-row bytes: 4 streams (x,y,z,out) double-buffered f32
    #              + in-kernel temporaries (concat 3*C, hidden 3*128, scores)
    per_row = (4 * 2 * C + 3 * C + 3 * 128 + 16) * 4
    tb = max(8, budget_bytes // per_row)
    tb = min(tb, 1024)
    if B <= tb:
        return B                      # full extent -> always a legal block shape
    return max(8, (tb // 8) * 8)      # multiple of 8 sublanes for clean tiling


def fusion_forward(x, y, z, w1, b1, w2, *, block_b=None):
    B, C = x.shape
    w2_row = w2.reshape(1, 128)       # layout plumbing only (Linear(128,1).weight)

    tb = _choose_block_b(B, C) if block_b is None else min(block_b, B)
    nb = pl.cdiv(B, tb)

    # Explicit VMEM limit: enough for this tiling, within v5e's default and
    # v7x's 64 MiB physical VMEM.
    stream_bytes = 4 * 2 * tb * C * 4
    weight_bytes = (C * 128 + 2 * 128) * 4
    scratch_bytes = (3 * tb * C + 3 * tb * 128 + 8 * tb) * 4
    vmem_limit = int(min(48 * 2**20,
                         max(16 * 2**20,
                             2 * (stream_bytes + weight_bytes + scratch_bytes))))

    cost = pl.CostEstimate(
        flops=2 * 3 * B * C * 128 + 2 * 3 * B * 128 + 8 * B * C,
        transcendentals=3 * B * 128 + 4 * B,
        bytes_accessed=4 * (4 * B * C + C * 128 + 2 * 128),
    )

    return pl.pallas_call(
        fusion_kernel,
        out_shape=jax.ShapeDtypeStruct((B, C), jnp.float32),
        grid=(nb,),
        in_specs=[
            pl.BlockSpec((tb, C), lambda i: (i, 0)),      # x   (streamed)
            pl.BlockSpec((tb, C), lambda i: (i, 0)),      # y   (streamed)
            pl.BlockSpec((tb, C), lambda i: (i, 0)),      # z   (streamed)
            pl.BlockSpec((C, 128), lambda i: (0, 0)),     # W1  (VMEM-resident)
            pl.BlockSpec((1, 128), lambda i: (0, 0)),     # b1  (VMEM-resident)
            pl.BlockSpec((1, 128), lambda i: (0, 0)),     # w2  (VMEM-resident)
        ],
        out_specs=pl.BlockSpec((tb, C), lambda i: (i, 0)),
        compiler_params=pltpu.CompilerParams(
            dimension_semantics=("parallel",),            # 2 TCs on v7x
            vmem_limit_bytes=vmem_limit,
        ),
        cost_estimate=cost,
    )(x, y, z, w1, b1, w2_row)


def xavier_normal(key, shape):
    # torch.nn.init.xavier_normal_: std = sqrt(2 / (fan_in + fan_out))
    fan_in, fan_out = shape[0], shape[1]   # stored as (in, out) for row-vector matmul
    std = jnp.sqrt(2.0 / (fan_in + fan_out))
    return std * jax.random.normal(key, shape, dtype=jnp.float32)


def reference_forward(x, y, z, w1, b1, w2, b2):
    feat = jnp.stack([x, y, z], axis=1)                          # (B, 3, C)
    h = jnp.tanh(jnp.einsum("bmc,ck->bmk", feat, w1) + b1)       # (B, 3, 128)
    s = jnp.einsum("bmk,ko->bmo", h, w2) + b2                    # (B, 3, 1)
    a = jax.nn.softmax(jnp.transpose(s, (0, 2, 1)), axis=2)      # (B, 1, 3)
    m = jnp.einsum("bom,bmc->boc", a, feat)                      # (B, 1, C)
    return m.reshape(m.shape[0], -1)


if __name__ == "__main__":
    B, C = 2, 32          # batch=2, hidden(config)=32

    key = jax.random.PRNGKey(0)
    kx, ky, kz, kw1, kw2 = jax.random.split(key, 5)

    x = jax.random.normal(kx, (B, C), dtype=jnp.float32)
    y = jax.random.normal(ky, (B, C), dtype=jnp.float32)
    z = jax.random.normal(kz, (B, C), dtype=jnp.float32)

    # Deterministic parameter init (xavier_normal for weights, zeros for biases,
    # matching xavier_init in the PyTorch module).
    w1 = xavier_normal(kw1, (C, 128))        # Linear(config, 128).weight^T
    b1 = jnp.zeros((1, 128), dtype=jnp.float32)
    w2 = xavier_normal(kw2, (128, 1))        # Linear(128, 1).weight^T
    b2 = jnp.zeros((1, 1), dtype=jnp.float32)   # kernel drops b2 (softmax shift-invariance)

    out = fusion_forward(x, y, z, w1, b1, w2)
    out = jax.block_until_ready(out)

    ref = reference_forward(x, y, z, w1, b1, w2, b2)
    assert out.shape == (B, C)
    # Tolerance slightly loosened for pl.reciprocal(approx=True).
    assert jnp.allclose(out, ref, atol=3e-3, rtol=3e-3), float(jnp.max(jnp.abs(out - ref)))

    print("KERNEL_OK")
</pallas_src>

<mosaic_0001>
module attributes {stable_mosaic.version = 11 : i64} {
  func.func @fusion_kernel(%arg0: i32, %arg1: memref<2x32xf32, #tpu.memory_space<vmem>>, %arg2: memref<2x32xf32, #tpu.memory_space<vmem>>, %arg3: memref<2x32xf32, #tpu.memory_space<vmem>>, %arg4: memref<32x128xf32, #tpu.memory_space<vmem>>, %arg5: memref<1x128xf32, #tpu.memory_space<vmem>>, %arg6: memref<1x128xf32, #tpu.memory_space<vmem>>, %arg7: memref<2x32xf32, #tpu.memory_space<vmem>>) attributes {dimension_semantics = [#tpu.dimension_semantics<parallel>], iteration_bounds = array<i64: 1>, scalar_prefetch = 0 : i64, scratch_operands = 0 : i64, tpu.core_type = #tpu.core_type<tc>, window_params = [{transform_indices = @transform_0, window_bounds = array<i64: 2, 32>}, {transform_indices = @transform_1, window_bounds = array<i64: 2, 32>}, {transform_indices = @transform_2, window_bounds = array<i64: 2, 32>}, {pipeline_mode = #tpu.pipeline_mode<synchronous>, transform_indices = @transform_3, window_bounds = array<i64: 32, 128>}, {pipeline_mode = #tpu.pipeline_mode<synchronous>, transform_indices = @transform_4, window_bounds = array<i64: 1, 128>}, {pipeline_mode = #tpu.pipeline_mode<synchronous>, transform_indices = @transform_5, window_bounds = array<i64: 1, 128>}, {transform_indices = @transform_6, window_bounds = array<i64: 2, 32>}]} {
    %c0 = arith.constant 0 : index
    %c0_0 = arith.constant 0 : index
    %0 = vector.load %arg1[%c0, %c0_0] : memref<2x32xf32, #tpu.memory_space<vmem>>, vector<2x32xf32>
    %c0_1 = arith.constant 0 : index
    %c0_2 = arith.constant 0 : index
    %1 = vector.load %arg2[%c0_1, %c0_2] : memref<2x32xf32, #tpu.memory_space<vmem>>, vector<2x32xf32>
    %c0_3 = arith.constant 0 : index
    %c0_4 = arith.constant 0 : index
    %2 = vector.load %arg3[%c0_3, %c0_4] : memref<2x32xf32, #tpu.memory_space<vmem>>, vector<2x32xf32>
    %c0_5 = arith.constant 0 : index
    %c0_6 = arith.constant 0 : index
    %3 = vector.load %arg4[%c0_5, %c0_6] : memref<32x128xf32, #tpu.memory_space<vmem>>, vector<32x128xf32>
    %c0_7 = arith.constant 0 : index
    %c0_8 = arith.constant 0 : index
    %4 = vector.load %arg5[%c0_7, %c0_8] : memref<1x128xf32, #tpu.memory_space<vmem>>, vector<1x128xf32>
    %c0_9 = arith.constant 0 : index
    %c0_10 = arith.constant 0 : index
    %5 = vector.load %arg6[%c0_9, %c0_10] : memref<1x128xf32, #tpu.memory_space<vmem>>, vector<1x128xf32>
    %6 = tpu.concatenate %0, %1, %2 in 0 : vector<2x32xf32>, vector<2x32xf32>, vector<2x32xf32> -> vector<6x32xf32>
    %cst = arith.constant dense<0.000000e+00> : vector<6x128xf32>
    %7 = tpu.matmul %6, %3, %cst {dimension_numbers = #tpu.dot_dimension_numbers<[1], [0], [0], [1], [0, 0, 1, 1], [], []>} : vector<6x32xf32>, vector<32x128xf32>, vector<6x128xf32> -> vector<6x128xf32>
    %8 = vector.broadcast %4 : vector<1x128xf32> to vector<6x128xf32>
    %9 = arith.addf %7, %8 : vector<6x128xf32>
    %10 = math.tanh %9 : vector<6x128xf32>
    %11 = vector.broadcast %5 : vector<1x128xf32> to vector<6x128xf32>
    %12 = arith.mulf %10, %11 : vector<6x128xf32>
    %cst_11 = arith.constant dense<0.000000e+00> : vector<6xf32>
    %13 = vector.multi_reduction <add>, %12, %cst_11 [1] : vector<6x128xf32> to vector<6xf32>
    %14 = vector.shape_cast %13 : vector<6xf32> to vector<6x1xf32>
    %15 = vector.extract_strided_slice %14 {offsets = [0, 0], sizes = [2, 1], strides = [1, 1]} : vector<6x1xf32> to vector<2x1xf32>
    %16 = vector.extract_strided_slice %14 {offsets = [2, 0], sizes = [2, 1], strides = [1, 1]} : vector<6x1xf32> to vector<2x1xf32>
    %17 = vector.extract_strided_slice %14 {offsets = [4, 0], sizes = [2, 1], strides = [1, 1]} : vector<6x1xf32> to vector<2x1xf32>
    %18 = arith.maximumf %15, %16 : vector<2x1xf32>
    %19 = arith.maximumf %18, %17 : vector<2x1xf32>
    %20 = arith.subf %15, %19 : vector<2x1xf32>
    %21 = math.exp %20 : vector<2x1xf32>
    %22 = arith.subf %16, %19 : vector<2x1xf32>
    %23 = math.exp %22 : vector<2x1xf32>
    %24 = arith.subf %17, %19 : vector<2x1xf32>
    %25 = math.exp %24 : vector<2x1xf32>
    %26 = arith.addf %21, %23 : vector<2x1xf32>
    %27 = arith.addf %26, %25 : vector<2x1xf32>
    %28 = tpu.reciprocal %27 {approx = true} : vector<2x1xf32> -> vector<2x1xf32>
    %29 = arith.mulf %21, %28 : vector<2x1xf32>
    %30 = vector.broadcast %29 : vector<2x1xf32> to vector<2x32xf32>
    %31 = arith.mulf %30, %0 : vector<2x32xf32>
    %32 = arith.mulf %23, %28 : vector<2x1xf32>
    %33 = vector.broadcast %32 : vector<2x1xf32> to vector<2x32xf32>
    %34 = arith.mulf %33, %1 : vector<2x32xf32>
    %35 = arith.addf %31, %34 : vector<2x32xf32>
    %36 = arith.mulf %25, %28 : vector<2x1xf32>
    %37 = vector.broadcast %36 : vector<2x1xf32> to vector<2x32xf32>
    %38 = arith.mulf %37, %2 : vector<2x32xf32>
    %39 = arith.addf %35, %38 : vector<2x32xf32>
    %c0_12 = arith.constant 0 : index
    %c0_13 = arith.constant 0 : index
    %40 = vector.load %arg7[%c0_12, %c0_13] : memref<2x32xf32, #tpu.memory_space<vmem>>, vector<2x32xf32>
    tpu.vector_store %arg7[%c0_12, %c0_13], %39 {strides = array<i32>} : memref<2x32xf32, #tpu.memory_space<vmem>>, vector<2x32xf32>,
    return
  }
  func.func @transform_0(%arg0: i32) -> (i32, i32) {
    %c0_i32 = arith.constant 0 : i32
    %c0_i32_0 = arith.constant 0 : i32
    return %arg0, %c0_i32 : i32, i32
  }
  func.func @transform_1(%arg0: i32) -> (i32, i32) {
    %c0_i32 = arith.constant 0 : i32
    %c0_i32_0 = arith.constant 0 : i32
    return %arg0, %c0_i32 : i32, i32
  }
  func.func @transform_2(%arg0: i32) -> (i32, i32) {
    %c0_i32 = arith.constant 0 : i32
    %c0_i32_0 = arith.constant 0 : i32
    return %arg0, %c0_i32 : i32, i32
  }
  func.func @transform_3(%arg0: i32) -> (i32, i32) {
    %c0_i32 = arith.constant 0 : i32
    %c0_i32_0 = arith.constant 0 : i32
    %c0_i32_1 = arith.constant 0 : i32
    return %c0_i32, %c0_i32_0 : i32, i32
  }
  func.func @transform_4(%arg0: i32) -> (i32, i32) {
    %c0_i32 = arith.constant 0 : i32
    %c0_i32_0 = arith.constant 0 : i32
    %c0_i32_1 = arith.constant 0 : i32
    return %c0_i32, %c0_i32_0 : i32, i32
  }
  func.func @transform_5(%arg0: i32) -> (i32, i32) {
    %c0_i32 = arith.constant 0 : i32
    %c0_i32_0 = arith.constant 0 : i32
    %c0_i32_1 = arith.constant 0 : i32
    return %c0_i32, %c0_i32_0 : i32, i32
  }
  func.func @transform_6(%arg0: i32) -> (i32, i32) {
    %c0_i32 = arith.constant 0 : i32
    %c0_i32_0 = arith.constant 0 : i32
    return %arg0, %c0_i32 : i32, i32
  }
}

</mosaic_0001>

<bundles_post_ra>
// kernel: tpu_custom_call.1
= control target key start
LH: loop header
LB: loop body
LE: loop exit
PB: predicated region body
PF: predicated region fallthrough
CT: control target
= control target key end

     0   :  { %11 = vsyncpa [#allocation3], 0  ;;  %s459_s0 = inlined_call_operand.hbm [shape: f32[2,32], index: 0, kind: input, shape index: {}]   ;;  %s460_s1 = inlined_call_operand.hbm [shape: f32[2,32], index: 1, kind: input, shape index: {}]   ;;  %s461_s2 = inlined_call_operand.vmem [shape: f32[2,32], index: 2, kind: input, shape index: {}]   ;;  %s462_s3 = inlined_call_operand.hbm [shape: f32[32,128], index: 3, kind: input, shape index: {}]   ;;  %s463_s4 = inlined_call_operand.vmem [shape: f32[1,128], index: 4, kind: input, shape index: {}]   ;;  %s464_s5 = inlined_call_operand.vmem [shape: f32[1,128], index: 5, kind: input, shape index: {}]   ;;  %s465_s6 = inlined_call_operand.hbm [shape: f32[2,32], index: 6, kind: output, shape index: {}]  }
   0x1   :  { %12 = vsyncpa [#allocation6], 0 }
   0x2   :  { %13 = vsyncpa [#allocation4], 0  ;;  %s380_s21 = smov [#allocation5]   ;;  %s381_s23 = smov [#allocation2]  }
   0x3   :  { %s30_s22 = sshll.u32 %s380_s21, 4  ;;  %s20_s24 = sshll.u32 %s381_s23, 4  ;;  %s31_s22 = int_to_ptr.vmem [resolvable:$true] %s30_s22  ;;  %s21_s24 = int_to_ptr.vmem [resolvable:$true] %s20_s24 }
   0x4   :  { %s302_s25 = scalar_lea.vmem %s31_s22, 32  ;;  %p307_p1 = scmp.lt.s32.totalorder %s31_s22, %s31_s22 }
   0x5   :  { %p303_p0 = scmp.ne.s32.totalorder %s31_s22, %s302_s25  ;;  %p308_p2 = scmp.lt.s32.totalorder %s302_s25, %s302_s25 }
   0x7   :  { %p309_p3 = por %p308_p2, %p307_p1 }
   0x9   :  { %p310_p4 = pnand %p309_p3, %p303_p0 }
   0xb   :  { %313 = shalt.err (!%p310_p4)
}
   0xc   :  { %33 = dma.hbm_to_vmem [thread:$0]  %s460_s1, 32, %s31_s22, [#allocation6]  }
   0xd   :  { %s322_s28 = scalar_lea.vmem %s21_s24, 32  ;;  %p327_p6 = scmp.lt.s32.totalorder %s21_s24, %s21_s24 }
   0xe   :  { %p323_p5 = scmp.ne.s32.totalorder %s21_s24, %s322_s28  ;;  %p328_p7 = scmp.lt.s32.totalorder %s322_s28, %s322_s28 }
  0x10   :  { %p329_p8 = por %p328_p7, %p327_p6 }
  0x12   :  { %p330_p9 = pnand %p329_p8, %p323_p5 }
  0x14   :  { %333 = shalt.err (!%p330_p9)
}
  0x15   :  { %23 = dma.hbm_to_vmem [thread:$0]  %s459_s0, 32, %s21_s24, [#allocation3]  }
  0x16   :  { %s382_s7 = smov [#allocation7]  }
  0x17   :  { %s41_s8 = sshll.u32 %s382_s7, 4  ;;  %s42_s8 = int_to_ptr.vmem [resolvable:$true] %s41_s8 }
  0x18   :  { %s342_s9 = scalar_lea.vmem %s42_s8, 512  ;;  %p347_p11 = scmp.lt.s32.totalorder %s42_s8, %s42_s8 }
  0x19   :  { %p343_p10 = scmp.ne.s32.totalorder %s42_s8, %s342_s9  ;;  %p348_p12 = scmp.lt.s32.totalorder %s342_s9, %s342_s9 }
  0x1b   :  { %p349_p13 = por %p348_p12, %p347_p11 }
  0x1d   :  { %p350_p0 = pnand %p349_p13, %p343_p10 }
  0x1f   :  { %353 = shalt.err (!%p350_p0)
}
  0x20   :  { %s383_s1 = smov 128   ;;  %s384_s10 = smov 8  }
  0x21   :  { %47 = dma.hbm_to_vmem [thread:$0]  %s462_s3, 512, %s42_s8, [#allocation6], %s383_s1, %s383_s1, %s384_s10  }
  0x22   :  { %374 = dma.done.wait [#allocation3], 32  }
  0x23   :  { %375 = vsyncadd [#allocation3], 4294967264 }
  0x24   :  { %376 = dma.done.wait [#allocation6], 544  }
  0x25   :  { %377 = vsyncadd [#allocation6], 4294966752  ;;  %v385_v0 = vmov 0.0   ;;  %vm386_vm0 = vmmov 0   ;;  %v67_v1 = vld [vmem:[#allocation7 + $0x18] sm:$0xff]  ;;  %v66_v2 = vld [vmem:[#allocation7 + $0x10] sm:$0xff] }
  0x26   :  { %262 = vmatprep.subr.mxu0 %v385_v0  ;;  %270 = vmatprep.mubr.msk.f32.mxu0 %vm386_vm0, %v385_v0  ;;  %v433_v3 = vld [vmem:[#allocation2] sm:$0x3]  ;;  %v435_v4 = vld [vmem:[#allocation5] sm:$0x3]  ;;  %vm76_vm1 = vcmask 1041408   ;;  %v65_v5 = vld [vmem:[#allocation7 + $0x8] sm:$0xff] }
  0x27   :  { %263 = vmatpush3.msra.mxu0 %v67_v1  ;;  %v440_v6 = vld [vmem:[%s461_s2] sm:$0x3]  ;;  %v71_v7 = vrot.slane %v435_v4, 6  ;;  %vm78_vm2 = vcmask 1043456   ;;  %v64_v9 = vld [vmem:[#allocation7] sm:$0xff]  ;;  %vm86_vm3 = vcmask 261120  }
  0x28   :  { %264 = vmatprep.subr.mxu0 %v385_v0  ;;  %v74_v8 = vrot.slane %v440_v6, 4  ;;  %v254_v12 = vld [vmem:[%s463_s4] ss:$0 sm:$0xff]  ;;  %vm168_vm4 = vcmask 1045504   ;;  %v387_v20 = vmov 0   ;;  %s388_s4 = smov [#allocation8]  }
  0x29   :  { %265 = vmatpush3.msra.mxu0 %v66_v2  ;;  %v77_v10 = vsel %vm76_vm1, %v433_v3, %v71_v7  ;;  %v256_v16 = vld [vmem:[%s464_s5] ss:$0 sm:$0xff]  ;;  %283 = vset.pattern.permute.xlu1 %v387_v20  ;;  %s244_s5 = sshll.u32 %s388_s4, 4  ;;  %vm236_vm5 = vcmask 254976   ;;  %s245_s5 = int_to_ptr.vmem [resolvable:$true] %s244_s5 }
  0x2a   :  { %266 = vmatprep.subr.mxu0 %v385_v0  ;;  %v79_v11 = vsel %vm78_vm2, %v77_v10, %v74_v8  ;;  %282 = vset.pattern.permute.xlu0 %v387_v20  ;;  %s354_s16 = scalar_lea.vmem %s245_s5, 32  ;;  %p359_p2 = scmp.lt.s32.totalorder %s245_s5, %s245_s5 }
  0x2b   :  { %267 = vmatpush3.msra.mxu0 %v65_v5  ;;  %p355_p1 = scmp.ne.s32.totalorder %s245_s5, %s354_s16  ;;  %p360_p3 = scmp.lt.s32.totalorder %s354_s16, %s354_s16 }
  0x2c   :  { %268 = vmatprep.subr.mxu0 %v385_v0 }
  0x2d   :  { %269 = vmatpush3.msra.mxu0 %v64_v9  ;;  %p361_p4 = por %p360_p3, %p359_p2 }
  0x2e   :  { %271 = vmatmul.mubr.msk.f32.vlgmr.msra.gmra.mxu0 %vm86_vm3, %v79_v11 }
  0x2f   :  { %p362_p5 = pnand %p361_p4, %p355_p1 }
  0xee   :  { %v156_v13 = vpop.f32.mrf.mxu0 }
  0xef   :  { %v157_v14 = vadd.f32 %v254_v12, %v156_v13 }
  0xf0   :  { %v272_v15 = vpop.f32.mrf.mxu0 }
  0xf1   :  { %284 = vtanh.f32 %v157_v14 }
  0xfe   :  { %v285_v17 = vpop.eup %284 }
  0xff   :  { %v167_v18 = vmul.f32 %v285_v17, %v256_v16 }
 0x101   :  { %v169_v19 = vsel %vm168_vm4, %v167_v18, 0.0 }
 0x102   :  { %170 = vadd.xlane.f32.xlu0 %v169_v19 }
 0x18b   :  { %v171_v21 = vpop.xlane.xlu0 %170 }
 0x18c   :  { %v173_v22 = vrot.slane %v171_v21, 2  ;;  %v176_v24 = vrot.slane %v171_v21, 4 }
 0x18e   :  { %v175_v23 = vmax.f32 %v171_v21, %v173_v22 }
 0x190   :  { %v178_v25 = vmax.f32 %v175_v23, %v176_v24 }
 0x192   :  { %v179_v26 = vsub.f32 %v171_v21, %v178_v25  ;;  %v183_v27 = vrot.slane %v178_v25, 6  ;;  %v188_v28 = vrot.slane %v178_v25, 4 }
 0x194   :  { %v185_v29 = vsub.f32 %v171_v21, %v183_v27  ;;  %v190_v30 = vsub.f32 %v171_v21, %v188_v28  ;;  %v180_v31 = vmul.f32 1.442695, %v179_v26 }
 0x196   :  { %v186_v32 = vmul.f32 1.442695, %v185_v29  ;;  %v191_v33 = vmul.f32 1.442695, %v190_v30 }
 0x198   :  { %286 = vpow2.f32 %v186_v32 }
 0x199   :  { %288 = vpow2.f32 %v191_v33 }
 0x19a   :  { %290 = vpow2.f32 %v180_v31 }
 0x1a5   :  { %v287_v34 = vpop.eup %286 }
 0x1a6   :  { %v289_v35 = vpop.eup %288  ;;  %v194_v36 = vrot.slane %v287_v34, 2 }
 0x1a7   :  { %v291_v37 = vpop.eup %290  ;;  %v198_v39 = vrot.slane %v289_v35, 4 }
 0x1a8   :  { %v196_v38 = vadd.f32 %v291_v37, %v194_v36 }
 0x1aa   :  { %v200_v40 = vadd.f32 %v198_v39, %v196_v38 }
 0x1ac   :  { %292 = vrcp.f32 %v200_v40 }
 0x1b9   :  { %v293_v41 = vpop.eup %292 }
 0x1ba   :  { %v202_v42 = vmul.f32 %v293_v41, %v291_v37  ;;  %v210_v43 = vrot.slane %v293_v41, 6  ;;  %v223_v44 = vrot.slane %v293_v41, 4 }
 0x1bc   :  { %205 = vperm.xlu1 %283, %v202_v42   ;;  %v212_v45 = vmul.f32 %v287_v34, %v210_v43  ;;  %v225_v46 = vmul.f32 %v289_v35, %v223_v44 }
 0x1be   :  { %215 = vperm.xlu0 %282, %v212_v45  }
 0x1c0   :  { %228 = vperm.xlu1 %283, %v225_v46  }
 0x237   :  { %v206_v47 = vpop.permute.xlu1 %205 }
 0x238   :  { %v208_v51 = vmul.f32 %v206_v47, %v433_v3 }
 0x239   :  { %v216_v48 = vpop.permute.xlu0 %215 }
 0x23a   :  { %v218_v49 = vmul.f32 %v216_v48, %v71_v7 }
 0x23b   :  { %v229_v50 = vpop.permute.xlu1 %228 }
 0x23c   :  { %v220_v52 = vrot.slane %v218_v49, 2  ;;  %v231_v53 = vmul.f32 %v229_v50, %v74_v8 }
 0x23e   :  { %v222_v54 = vadd.f32 %v220_v52, %v208_v51  ;;  %v233_v55 = vrot.slane %v231_v53, 4 }
 0x240   :  { %v235_v56 = vadd.f32 %v233_v55, %v222_v54 }
 0x242   :  { %237 = vst.msk [vmem:[#allocation8] sm:$0x3] %vm236_vm5, %v235_v56 }
 0x243   :  { %365 = shalt.err (!%p362_p5)
}
 0x244   :  { %247 = dma.vmem_to_hbm [thread:$0]  %s245_s5, 32, %s465_s6, [#allocation4]  }
 0x245   :  { %378 = dma.done.wait [#allocation4], 32  }
 0x246   :  { %379 = vsyncadd [#allocation4], 4294967264 }
 0x247   :  { %251 = vsyncpa [#allocation3], 1 }
 0x248   :  { %252 = vsyncpa [#allocation6], 1 }
 0x249   :  { %253 = vsyncpa [#allocation4], 1 }

</bundles_post_ra>
